<compile_context>
chip_gen: v6e
topology: v6e:2x2x1
jax: 0.10.0
libtpu: 0.0.40
codegen_flags: <defaults>
</compile_context>

<pallas_src>
import functools

import jax
import jax.numpy as jnp
from jax.experimental import pallas as pl
from jax.experimental.pallas import tpu as pltpu

NEG_SLOPE = 0.7195699
CIN, COUT, KH, KW = 2, 2, 2, 2
NTAPS = CIN * KH * KW  # 8


def conv_leaky_kernel(w_ref, b_ref, x_ref, o_ref, *, W):
    # w_ref: (COUT*CIN*KH*KW,) f32 SMEM  (scalar-prefetched, flattened OIHW)
    # b_ref: (COUT,)           f32 SMEM  (scalar-prefetched)
    # x_ref: (B, CIN, H*W)     f32 VMEM  (lane-dense flat spatial axis)
    # o_ref: (B, COUT, H*W)    f32 VMEM  (stored dense; cropped in wrapper)
    x = x_ref[...]
    HW = x.shape[-1]

    # Hoist all scalar SMEM reads off the VPU critical path.
    w = [w_ref[i] for i in range(COUT * NTAPS)]
    b = [b_ref[c] for c in range(COUT)]

    # 4 shifted copies (one per kernel offset), shared by all Cin and Cout.
    # shifted[kh*KW+kw][n, ci, i] == x[n, ci, (i + kh*W + kw) mod HW]; the
    # wrap-around rows/cols are sliced off in the wrapper.
    shifted = []
    for kh in range(KH):
        for kw in range(KW):
            s = kh * W + kw
            shifted.append(x if s == 0 else pltpu.roll(x, shift=HW - s, axis=2))

    outs = []
    for co in range(COUT):
        base = co * NTAPS
        terms = []
        for ci in range(CIN):
            for k in range(KH * KW):
                terms.append(shifted[k][:, ci, :] * w[base + ci * KH * KW + k])
        # Tree-sum the 8 taps (depth 3) instead of an 8-deep serial FMA chain.
        acc = (((terms[0] + terms[1]) + (terms[2] + terms[3]))
               + ((terms[4] + terms[5]) + (terms[6] + terms[7]))) + b[co]
        # leaky-relu with 0 < slope < 1:  where(v>0, v, v*ns) == max(v, v*ns)
        outs.append(jnp.maximum(acc, acc * NEG_SLOPE))

    # Single fused, lane-dense store of both output channels.
    o_ref[...] = jnp.stack(outs, axis=1)


def _pick_block_n(n, target=256):
    """Largest batch block <= target that divides n (n itself if small)."""
    if n <= target:
        return n
    for bsz in range(target, 0, -1):
        if n % bsz == 0:
            return bsz
    return 1


def model_forward(x, weight, bias):
    """x: (N, CIN, H, W) f32; weight: (COUT, CIN, KH, KW) f32; bias: (COUT,) f32."""
    N, _, H, W = x.shape
    Ho, Wo = H - KH + 1, W - KW + 1
    HW = H * W

    x_flat = x.reshape(N, CIN, HW)          # lane-dense flat spatial axis
    block_n = _pick_block_n(N)
    grid = (N // block_n,)

    kernel = functools.partial(conv_leaky_kernel, W=W)
    out_flat = pl.pallas_call(
        kernel,
        out_shape=jax.ShapeDtypeStruct((N, COUT, HW), jnp.float32),
        grid_spec=pltpu.PrefetchScalarGridSpec(
            num_scalar_prefetch=2,
            grid=grid,
            in_specs=[
                pl.BlockSpec((block_n, CIN, HW), lambda n, w, b: (n, 0, 0)),
            ],
            out_specs=pl.BlockSpec((block_n, COUT, HW),
                                   lambda n, w, b: (n, 0, 0)),
        ),
        compiler_params=pltpu.CompilerParams(
            dimension_semantics=("parallel",) if grid[0] > 1 else ("arbitrary",)),
    )(weight.reshape(-1), bias, x_flat)

    # Crop the roll wrap-around border (h >= Ho, w >= Wo) after reshaping back.
    return out_flat.reshape(N, COUT, H, W)[:, :, :Ho, :Wo]


def reference_forward(x, weight, bias):
    v1 = jax.lax.conv_general_dilated(
        x, weight, window_strides=(1, 1), padding="VALID",
        dimension_numbers=("NCHW", "OIHW", "NCHW"))
    v1 = v1 + bias.reshape(1, COUT, 1, 1)
    return jnp.where(v1 > 0, v1, v1 * NEG_SLOPE)


if __name__ == "__main__":
    key = jax.random.PRNGKey(0)
    kx, kw, kb = jax.random.split(key, 3)

    # Deterministic parameter init mimicking PyTorch Conv2d default:
    # uniform(-b, b) with b = 1/sqrt(fan_in), fan_in = Cin*KH*KW = 8.
    bound = 1.0 / jnp.sqrt(jnp.float32(CIN * KH * KW))
    weight = jax.random.uniform(kw, (COUT, CIN, KH, KW), jnp.float32,
                                minval=-bound, maxval=bound)
    bias = jax.random.uniform(kb, (COUT,), jnp.float32,
                              minval=-bound, maxval=bound)

    # Small input consistent with the module: N=2, C=2, H=W=16.
    x = jax.random.normal(kx, (2, CIN, 16, 16), jnp.float32)

    out = model_forward(x, weight, bias)
    out = jax.block_until_ready(out)

    ref = reference_forward(x, weight, bias)
    assert out.shape == (2, COUT, 15, 15)
    assert jnp.allclose(out, ref, atol=1e-5, rtol=1e-5)

    print("KERNEL_OK")
</pallas_src>

<mosaic_0001>
module attributes {stable_mosaic.version = 11 : i64} {
  func.func @conv_leaky_kernel(%arg0: i32, %arg1: memref<16xf32, #tpu.memory_space<smem>>, %arg2: memref<2xf32, #tpu.memory_space<smem>>, %arg3: memref<2x2x256xf32, #tpu.memory_space<vmem>>, %arg4: memref<2x2x256xf32, #tpu.memory_space<vmem>>) attributes {dimension_semantics = [#tpu.dimension_semantics<arbitrary>], iteration_bounds = array<i64: 1>, scalar_prefetch = 2 : i64, scratch_operands = 0 : i64, tpu.core_type = #tpu.core_type<tc>, window_params = [{transform_indices = @transform_0, window_bounds = array<i64: 2, 2, 256>}, {transform_indices = @transform_1, window_bounds = array<i64: 2, 2, 256>}]} {
    %c0 = arith.constant 0 : index
    %c0_0 = arith.constant 0 : index
    %c0_1 = arith.constant 0 : index
    %0 = vector.load %arg3[%c0, %c0_0, %c0_1] : memref<2x2x256xf32, #tpu.memory_space<vmem>>, vector<2x2x256xf32>
    %c0_2 = arith.constant 0 : index
    %1 = memref.load %arg1[%c0_2] : memref<16xf32, #tpu.memory_space<smem>>
    %c1 = arith.constant 1 : index
    %2 = memref.load %arg1[%c1] : memref<16xf32, #tpu.memory_space<smem>>
    %c2 = arith.constant 2 : index
    %3 = memref.load %arg1[%c2] : memref<16xf32, #tpu.memory_space<smem>>
    %c3 = arith.constant 3 : index
    %4 = memref.load %arg1[%c3] : memref<16xf32, #tpu.memory_space<smem>>
    %c4 = arith.constant 4 : index
    %5 = memref.load %arg1[%c4] : memref<16xf32, #tpu.memory_space<smem>>
    %c5 = arith.constant 5 : index
    %6 = memref.load %arg1[%c5] : memref<16xf32, #tpu.memory_space<smem>>
    %c6 = arith.constant 6 : index
    %7 = memref.load %arg1[%c6] : memref<16xf32, #tpu.memory_space<smem>>
    %c7 = arith.constant 7 : index
    %8 = memref.load %arg1[%c7] : memref<16xf32, #tpu.memory_space<smem>>
    %c8 = arith.constant 8 : index
    %9 = memref.load %arg1[%c8] : memref<16xf32, #tpu.memory_space<smem>>
    %c9 = arith.constant 9 : index
    %10 = memref.load %arg1[%c9] : memref<16xf32, #tpu.memory_space<smem>>
    %c10 = arith.constant 10 : index
    %11 = memref.load %arg1[%c10] : memref<16xf32, #tpu.memory_space<smem>>
    %c11 = arith.constant 11 : index
    %12 = memref.load %arg1[%c11] : memref<16xf32, #tpu.memory_space<smem>>
    %c12 = arith.constant 12 : index
    %13 = memref.load %arg1[%c12] : memref<16xf32, #tpu.memory_space<smem>>
    %c13 = arith.constant 13 : index
    %14 = memref.load %arg1[%c13] : memref<16xf32, #tpu.memory_space<smem>>
    %c14 = arith.constant 14 : index
    %15 = memref.load %arg1[%c14] : memref<16xf32, #tpu.memory_space<smem>>
    %c15 = arith.constant 15 : index
    %16 = memref.load %arg1[%c15] : memref<16xf32, #tpu.memory_space<smem>>
    %c0_3 = arith.constant 0 : index
    %17 = memref.load %arg2[%c0_3] : memref<2xf32, #tpu.memory_space<smem>>
    %c1_4 = arith.constant 1 : index
    %18 = memref.load %arg2[%c1_4] : memref<2xf32, #tpu.memory_space<smem>>
    %c255_i32 = arith.constant 255 : i32
    %19 = tpu.dynamic_rotate %0 by %c255_i32 dim 2 : vector<2x2x256xf32>, i32 -> vector<2x2x256xf32>
    %c240_i32 = arith.constant 240 : i32
    %20 = tpu.dynamic_rotate %0 by %c240_i32 dim 2 : vector<2x2x256xf32>, i32 -> vector<2x2x256xf32>
    %c239_i32 = arith.constant 239 : i32
    %21 = tpu.dynamic_rotate %0 by %c239_i32 dim 2 : vector<2x2x256xf32>, i32 -> vector<2x2x256xf32>
    %22 = vector.extract_strided_slice %0 {offsets = [0, 0, 0], sizes = [2, 1, 256], strides = [1, 1, 1]} : vector<2x2x256xf32> to vector<2x1x256xf32>
    %23 = vector.shape_cast %22 : vector<2x1x256xf32> to vector<2x256xf32>
    %24 = vector.broadcast %1 : f32 to vector<2x256xf32>
    %25 = arith.mulf %23, %24 : vector<2x256xf32>
    %26 = vector.extract_strided_slice %19 {offsets = [0, 0, 0], sizes = [2, 1, 256], strides = [1, 1, 1]} : vector<2x2x256xf32> to vector<2x1x256xf32>
    %27 = vector.shape_cast %26 : vector<2x1x256xf32> to vector<2x256xf32>
    %28 = vector.broadcast %2 : f32 to vector<2x256xf32>
    %29 = arith.mulf %27, %28 : vector<2x256xf32>
    %30 = vector.extract_strided_slice %20 {offsets = [0, 0, 0], sizes = [2, 1, 256], strides = [1, 1, 1]} : vector<2x2x256xf32> to vector<2x1x256xf32>
    %31 = vector.shape_cast %30 : vector<2x1x256xf32> to vector<2x256xf32>
    %32 = vector.broadcast %3 : f32 to vector<2x256xf32>
    %33 = arith.mulf %31, %32 : vector<2x256xf32>
    %34 = vector.extract_strided_slice %21 {offsets = [0, 0, 0], sizes = [2, 1, 256], strides = [1, 1, 1]} : vector<2x2x256xf32> to vector<2x1x256xf32>
    %35 = vector.shape_cast %34 : vector<2x1x256xf32> to vector<2x256xf32>
    %36 = vector.broadcast %4 : f32 to vector<2x256xf32>
    %37 = arith.mulf %35, %36 : vector<2x256xf32>
    %38 = vector.extract_strided_slice %0 {offsets = [0, 1, 0], sizes = [2, 1, 256], strides = [1, 1, 1]} : vector<2x2x256xf32> to vector<2x1x256xf32>
    %39 = vector.shape_cast %38 : vector<2x1x256xf32> to vector<2x256xf32>
    %40 = vector.broadcast %5 : f32 to vector<2x256xf32>
    %41 = arith.mulf %39, %40 : vector<2x256xf32>
    %42 = vector.extract_strided_slice %19 {offsets = [0, 1, 0], sizes = [2, 1, 256], strides = [1, 1, 1]} : vector<2x2x256xf32> to vector<2x1x256xf32>
    %43 = vector.shape_cast %42 : vector<2x1x256xf32> to vector<2x256xf32>
    %44 = vector.broadcast %6 : f32 to vector<2x256xf32>
    %45 = arith.mulf %43, %44 : vector<2x256xf32>
    %46 = vector.extract_strided_slice %20 {offsets = [0, 1, 0], sizes = [2, 1, 256], strides = [1, 1, 1]} : vector<2x2x256xf32> to vector<2x1x256xf32>
    %47 = vector.shape_cast %46 : vector<2x1x256xf32> to vector<2x256xf32>
    %48 = vector.broadcast %7 : f32 to vector<2x256xf32>
    %49 = arith.mulf %47, %48 : vector<2x256xf32>
    %50 = vector.extract_strided_slice %21 {offsets = [0, 1, 0], sizes = [2, 1, 256], strides = [1, 1, 1]} : vector<2x2x256xf32> to vector<2x1x256xf32>
    %51 = vector.shape_cast %50 : vector<2x1x256xf32> to vector<2x256xf32>
    %52 = vector.broadcast %8 : f32 to vector<2x256xf32>
    %53 = arith.mulf %51, %52 : vector<2x256xf32>
    %54 = arith.addf %25, %29 : vector<2x256xf32>
    %55 = arith.addf %33, %37 : vector<2x256xf32>
    %56 = arith.addf %54, %55 : vector<2x256xf32>
    %57 = arith.addf %41, %45 : vector<2x256xf32>
    %58 = arith.addf %49, %53 : vector<2x256xf32>
    %59 = arith.addf %57, %58 : vector<2x256xf32>
    %60 = arith.addf %56, %59 : vector<2x256xf32>
    %61 = vector.broadcast %17 : f32 to vector<2x256xf32>
    %62 = arith.addf %60, %61 : vector<2x256xf32>
    %cst = arith.constant 0.719569921 : f32
    %63 = vector.broadcast %cst : f32 to vector<2x256xf32>
    %64 = arith.mulf %62, %63 : vector<2x256xf32>
    %65 = arith.maximumf %62, %64 : vector<2x256xf32>
    %66 = vector.extract_strided_slice %0 {offsets = [0, 0, 0], sizes = [2, 1, 256], strides = [1, 1, 1]} : vector<2x2x256xf32> to vector<2x1x256xf32>
    %67 = vector.shape_cast %66 : vector<2x1x256xf32> to vector<2x256xf32>
    %68 = vector.broadcast %9 : f32 to vector<2x256xf32>
    %69 = arith.mulf %67, %68 : vector<2x256xf32>
    %70 = vector.extract_strided_slice %19 {offsets = [0, 0, 0], sizes = [2, 1, 256], strides = [1, 1, 1]} : vector<2x2x256xf32> to vector<2x1x256xf32>
    %71 = vector.shape_cast %70 : vector<2x1x256xf32> to vector<2x256xf32>
    %72 = vector.broadcast %10 : f32 to vector<2x256xf32>
    %73 = arith.mulf %71, %72 : vector<2x256xf32>
    %74 = vector.extract_strided_slice %20 {offsets = [0, 0, 0], sizes = [2, 1, 256], strides = [1, 1, 1]} : vector<2x2x256xf32> to vector<2x1x256xf32>
    %75 = vector.shape_cast %74 : vector<2x1x256xf32> to vector<2x256xf32>
    %76 = vector.broadcast %11 : f32 to vector<2x256xf32>
    %77 = arith.mulf %75, %76 : vector<2x256xf32>
    %78 = vector.extract_strided_slice %21 {offsets = [0, 0, 0], sizes = [2, 1, 256], strides = [1, 1, 1]} : vector<2x2x256xf32> to vector<2x1x256xf32>
    %79 = vector.shape_cast %78 : vector<2x1x256xf32> to vector<2x256xf32>
    %80 = vector.broadcast %12 : f32 to vector<2x256xf32>
    %81 = arith.mulf %79, %80 : vector<2x256xf32>
    %82 = vector.extract_strided_slice %0 {offsets = [0, 1, 0], sizes = [2, 1, 256], strides = [1, 1, 1]} : vector<2x2x256xf32> to vector<2x1x256xf32>
    %83 = vector.shape_cast %82 : vector<2x1x256xf32> to vector<2x256xf32>
    %84 = vector.broadcast %13 : f32 to vector<2x256xf32>
    %85 = arith.mulf %83, %84 : vector<2x256xf32>
    %86 = vector.extract_strided_slice %19 {offsets = [0, 1, 0], sizes = [2, 1, 256], strides = [1, 1, 1]} : vector<2x2x256xf32> to vector<2x1x256xf32>
    %87 = vector.shape_cast %86 : vector<2x1x256xf32> to vector<2x256xf32>
    %88 = vector.broadcast %14 : f32 to vector<2x256xf32>
    %89 = arith.mulf %87, %88 : vector<2x256xf32>
    %90 = vector.extract_strided_slice %20 {offsets = [0, 1, 0], sizes = [2, 1, 256], strides = [1, 1, 1]} : vector<2x2x256xf32> to vector<2x1x256xf32>
    %91 = vector.shape_cast %90 : vector<2x1x256xf32> to vector<2x256xf32>
    %92 = vector.broadcast %15 : f32 to vector<2x256xf32>
    %93 = arith.mulf %91, %92 : vector<2x256xf32>
    %94 = vector.extract_strided_slice %21 {offsets = [0, 1, 0], sizes = [2, 1, 256], strides = [1, 1, 1]} : vector<2x2x256xf32> to vector<2x1x256xf32>
    %95 = vector.shape_cast %94 : vector<2x1x256xf32> to vector<2x256xf32>
    %96 = vector.broadcast %16 : f32 to vector<2x256xf32>
    %97 = arith.mulf %95, %96 : vector<2x256xf32>
    %98 = arith.addf %69, %73 : vector<2x256xf32>
    %99 = arith.addf %77, %81 : vector<2x256xf32>
    %100 = arith.addf %98, %99 : vector<2x256xf32>
    %101 = arith.addf %85, %89 : vector<2x256xf32>
    %102 = arith.addf %93, %97 : vector<2x256xf32>
    %103 = arith.addf %101, %102 : vector<2x256xf32>
    %104 = arith.addf %100, %103 : vector<2x256xf32>
    %105 = vector.broadcast %18 : f32 to vector<2x256xf32>
    %106 = arith.addf %104, %105 : vector<2x256xf32>
    %cst_5 = arith.constant 0.719569921 : f32
    %107 = vector.broadcast %cst_5 : f32 to vector<2x256xf32>
    %108 = arith.mulf %106, %107 : vector<2x256xf32>
    %109 = arith.maximumf %106, %108 : vector<2x256xf32>
    %110 = vector.shape_cast %65 : vector<2x256xf32> to vector<2x1x256xf32>
    %111 = vector.shape_cast %109 : vector<2x256xf32> to vector<2x1x256xf32>
    %112 = tpu.concatenate %110, %111 in 1 : vector<2x1x256xf32>, vector<2x1x256xf32> -> vector<2x2x256xf32>
    %c0_6 = arith.constant 0 : index
    %c0_7 = arith.constant 0 : index
    %c0_8 = arith.constant 0 : index
    %113 = vector.load %arg4[%c0_6, %c0_7, %c0_8] : memref<2x2x256xf32, #tpu.memory_space<vmem>>, vector<2x2x256xf32>
    tpu.vector_store %arg4[%c0_6, %c0_7, %c0_8], %112 {strides = array<i32>} : memref<2x2x256xf32, #tpu.memory_space<vmem>>, vector<2x2x256xf32>,
    return
  }
  func.func @transform_0(%arg0: i32, %arg1: memref<16xf32, #tpu.memory_space<smem>>, %arg2: memref<2xf32, #tpu.memory_space<smem>>) -> (i32, i32, i32) {
    %c0_i32 = arith.constant 0 : i32
    %c0_i32_0 = arith.constant 0 : i32
    %c0_i32_1 = arith.constant 0 : i32
    return %arg0, %c0_i32, %c0_i32_0 : i32, i32, i32
  }
  func.func @transform_1(%arg0: i32, %arg1: memref<16xf32, #tpu.memory_space<smem>>, %arg2: memref<2xf32, #tpu.memory_space<smem>>) -> (i32, i32, i32) {
    %c0_i32 = arith.constant 0 : i32
    %c0_i32_0 = arith.constant 0 : i32
    %c0_i32_1 = arith.constant 0 : i32
    return %arg0, %c0_i32, %c0_i32_0 : i32, i32, i32
  }
}

</mosaic_0001>

<bundles_post_ra>
// kernel: tpu_custom_call.1
= control target key start
LH: loop header
LB: loop body
LE: loop exit
PB: predicated region body
PF: predicated region fallthrough
CT: control target
= control target key end

     0   :  { %s618_s12 = smov [#allocation3]   ;;  %s853_s0 = inlined_call_operand.hbm [shape: f32[16], index: 0, kind: input, shape index: {}]   ;;  %s854_s2 = inlined_call_operand.hbm [shape: f32[2,2,256], index: 2, kind: input, shape index: {}]   ;;  %s855_s3 = inlined_call_operand.hbm [shape: f32[2,2,256], index: 3, kind: output, shape index: {}]   ;;  %s856_s1 = inlined_call_operand.vmem [shape: f32[2], index: 1, kind: input, shape index: {}]  }
   0x1   :  { %9 = dma.hbm_to_smem %s853_s0, 16, %s618_s12, [#allocation2] }
   0x2   :  { %s10_s17 = sshll.u32 %s856_s1, 4  ;;  %s11_s17 = int_to_ptr.vmem [resolvable:$true] %s10_s17 }
   0x3   :  { %s560_s18 = scalar_lea.vmem %s11_s17, 16  ;;  %p565_p1 = scmp.lt.s32.totalorder %s11_s17, %s11_s17 }
   0x4   :  { %p561_p0 = scmp.ne.s32.totalorder %s11_s17, %s560_s18  ;;  %p566_p2 = scmp.lt.s32.totalorder %s560_s18, %s560_s18 }
   0x6   :  { %p567_p3 = por %p566_p2, %p565_p1 }
   0x8   :  { %p568_p4 = pnand %p567_p3, %p561_p0 }
   0xa   :  { %571 = shalt.err (!%p568_p4)  }
   0xb   :  { %s619_s19 = smov [#allocation4]  }
   0xc   :  { %13 = dma.vmem_to_smem %s11_s17, 16, %s619_s19, [#allocation2] }
   0xd   :  { %612 = dma.done.wait [#allocation2], 32 }
   0xe   :  { %613 = vsyncadd [#allocation2], 4294967264 }
   0xf   :  { %15 = sfence }
  0x10   :  { %16 = vsyncpa [#allocation6], 0 }
  0x11   :  { %17 = vsyncpa [#allocation7], 0  ;;  %s620_s0 = smov [#allocation5]  }
  0x12   :  { %s23_s20 = sshll.u32 %s620_s0, 4  ;;  %s24_s20 = int_to_ptr.vmem [resolvable:$true] %s23_s20 }
  0x13   :  { %s580_s21 = scalar_lea.vmem %s24_s20, 128  ;;  %p585_p6 = scmp.lt.s32.totalorder %s24_s20, %s24_s20 }
  0x14   :  { %p581_p5 = scmp.ne.s32.totalorder %s24_s20, %s580_s21  ;;  %p586_p7 = scmp.lt.s32.totalorder %s580_s21, %s580_s21 }
  0x16   :  { %p587_p8 = por %p586_p7, %p585_p6 }
  0x18   :  { %p588_p9 = pnand %p587_p8, %p581_p5 }
  0x1a   :  { %591 = shalt.err (!%p588_p9)
}
  0x1b   :  { %s621_s1 = smov 64   ;;  %s622_s22 = smov 4  }
  0x1c   :  { %29 = dma.hbm_to_vmem [thread:$0]  %s854_s2, 128, %s24_s20, [#allocation6], %s621_s1, %s621_s1, %s622_s22  }
  0x1d   :  { %614 = dma.done.wait [#allocation6], 128  }
  0x1e   :  { %615 = vsyncadd [#allocation6], 4294967168  ;;  %v58_v0 = vlaneseq  ;;  %v623_v1 = vmov 1983009808   ;;  %v34_v6 = vld [vmem:[#allocation5 + $0x4] sm:$0xf] }
  0x1f   :  { %v56_v2 = vunpack.c.l.s4 %v623_v1  ;;  %v33_v7 = vld [vmem:[#allocation5] sm:$0xf]  ;;  %s624_s25 = smov 112   ;;  %s625_s2 = smov 127   ;;  %vm474_vm3 = vcmask 1040384  }
  0x20   :  { %v660_v3 = vshrl.u32 %v58_v0, 7  ;;  %s626_s26 = smov 111   ;;  %s35_s27 = sld [smem:[#allocation3]]  ;;  %v679_v12 = vand.u32 127, %v58_v0 }
  0x21   :  { %v57_v4 = vunpack.c.0.s8 %v56_v2  ;;  %s520_s28 = sld [smem:[#allocation3 + $0x1]]  ;;  %s627_s18 = smov [#allocation8]  }
  0x22   :  { %s667_s29 = sld [smem:[#allocation3 + $0x4]]  ;;  %vm85_vm0 = vcmp.lt.s32.totalorder %v679_v12, 127  ;;  %vm98_vm1 = vcmp.lt.s32.totalorder %v679_v12, 112  ;;  %vm111_vm2 = vcmp.lt.s32.totalorder %v679_v12, 111  ;;  %s508_s19 = sshll.u32 %s627_s18, 4  ;;  %s509_s19 = int_to_ptr.vmem [resolvable:$true] %s508_s19 }
  0x23   :  { %v663_v5 = vsub.s32 %v57_v4, %v660_v3  ;;  %s524_s30 = sld [smem:[#allocation3 + $0x5]]  ;;  %s592_s0 = scalar_lea.vmem %s509_s19, 128 }
  0x24   :  { %s527_s4 = sld [smem:[#allocation3 + $0x8]]  ;;  %p593_p10 = scmp.ne.s32.totalorder %s509_s19, %s592_s0 }
  0x25   :  { %v69_v8 = vrot.slane %v34_v6, %v663_v5  ;;  %v61_v9 = vrot.slane %v33_v7, %v663_v5  ;;  %s528_s5 = sld [smem:[#allocation3 + $0x9]]  ;;  %p597_p11 = scmp.lt.s32.totalorder %s509_s19, %s509_s19 }
  0x26   :  { %s669_s6 = sld [smem:[#allocation3 + $0xc]]  ;;  %v116_v13 = vstv %s35_s27  ;;  %p598_p12 = scmp.lt.s32.totalorder %s592_s0, %s592_s0 }
  0x27   :  { %92 = vrot.lane.b32.xlu1 %v69_v8, %s624_s25  ;;  %75 = vrot.lane.b32.xlu0 %v61_v9, %s625_s2  ;;  %v62_v10 = vcombine.high %v61_v9, %v61_v9  ;;  %v70_v11 = vcombine.high %v69_v8, %v69_v8  ;;  %s532_s7 = sld [smem:[#allocation3 + $0xd]]  ;;  %v117_v18 = vmul.f32 %v116_v13, %v33_v7  ;;  %v119_v20 = vstv %s520_s28 }
  0x28   :  { %s521_s8 = sld [smem:[#allocation3 + $0x2]]  ;;  %v134_v14 = vstv %s667_s29  ;;  %v694_v23 = vmul.f32 %v116_v13, %v34_v6  ;;  %p599_p13 = por %p598_p12, %p597_p11 }
  0x29   :  { %s671_s9 = sld [smem:[#allocation3 + $0x6]]  ;;  %v135_v21 = vmul.f32 %v134_v14, %v33_v7  ;;  %v137_v22 = vstv %s524_s30  ;;  %v696_v26 = vmul.f32 %v134_v14, %v34_v6 }
  0x2a   :  { %s673_s10 = sld [smem:[#allocation3 + $0xa]]  ;;  %v273_v15 = vstv %s527_s4  ;;  %p600_p0 = pnand %p599_p13, %p593_p10 }
  0x2b   :  { %77 = vrot.lane.b32.xlu0 %v69_v8, %s625_s2  ;;  %79 = vrot.lane.b32.xlu1 %v62_v10, %s625_s2  ;;  %s675_s11 = sld [smem:[#allocation3 + $0xe]]  ;;  %v274_v24 = vmul.f32 %v273_v15, %v33_v7  ;;  %v276_v25 = vstv %s528_s5  ;;  %v698_v27 = vmul.f32 %v273_v15, %v34_v6 }
  0x2c   :  { %s677_s12 = sld [smem:[#allocation3 + $0x3]]  ;;  %v291_v19 = vstv %s669_s6 }
  0x2d   :  { %s681_s13 = sld [smem:[#allocation3 + $0x7]]  ;;  %v292_v28 = vmul.f32 %v291_v19, %v33_v7  ;;  %v294_v29 = vstv %s532_s7  ;;  %v700_v30 = vmul.f32 %v291_v19, %v34_v6 }
  0x2e   :  { %s683_s14 = sld [smem:[#allocation3 + $0xb]]  ;;  %v703_v31 = vstv %s521_s8 }
  0x2f   :  { %90 = vrot.lane.b32.xlu0 %v61_v9, %s624_s25  ;;  %81 = vrot.lane.b32.xlu1 %v70_v11, %s625_s2  ;;  %s686_s15 = sld [smem:[#allocation3 + $0xf]]  ;;  %v706_v34 = vstv %s671_s9 }
  0x30   :  { %s692_s16 = sld [smem:[#allocation4]]  ;;  %v709_v35 = vstv %s673_s10 }
  0x31   :  { %v712_v36 = vstv %s675_s11  ;;  %s727_s17 = sld [smem:[#allocation4 + $0x1]] }
  0x32   :  { %v715_v37 = vstv %s677_s12 }
  0x33   :  { %94 = vrot.lane.b32.xlu0 %v62_v10, %s624_s25  ;;  %96 = vrot.lane.b32.xlu1 %v70_v11, %s624_s25  ;;  %v722_v40 = vstv %s681_s13 }
  0x34   :  { %v725_v41 = vstv %s683_s14 }
  0x35   :  { %v730_v54 = vstv %s686_s15 }
  0x36   :  { %v266_v55 = vstv %s692_s16 }
  0x37   :  { %103 = vrot.lane.b32.xlu0 %v61_v9, %s626_s26  ;;  %105 = vrot.lane.b32.xlu1 %v69_v8, %s626_s26 }
  0x3b   :  { %107 = vrot.lane.b32.xlu0 %v62_v10, %s626_s26  ;;  %109 = vrot.lane.b32.xlu1 %v70_v11, %s626_s26 }
  0x99   :  { %v688_v16 = vpop.permute.xlu1 %92  ;;  %v76_v17 = vpop.permute.xlu0 %75 }
  0x9d   :  { %v78_v32 = vpop.permute.xlu0 %77  ;;  %v80_v33 = vpop.permute.xlu1 %79 }
  0x9e   :  { %v86_v38 = vsel %vm85_vm0, %v76_v17, %v80_v33  ;;  %v88_v39 = vsel %vm85_vm0, %v80_v33, %v76_v17 }
  0x9f   :  { %v120_v42 = vmul.f32 %v119_v20, %v86_v38  ;;  %v121_v43 = vmul.f32 %v119_v20, %v88_v39  ;;  %v138_v44 = vmul.f32 %v137_v22, %v86_v38  ;;  %v139_v45 = vmul.f32 %v137_v22, %v88_v39 }
  0xa0   :  { %v277_v46 = vmul.f32 %v276_v25, %v86_v38  ;;  %v278_v47 = vmul.f32 %v276_v25, %v88_v39  ;;  %v295_v48 = vmul.f32 %v294_v29, %v86_v38  ;;  %v296_v49 = vmul.f32 %v294_v29, %v88_v39 }
  0xa1   :  { %v156_v50 = vcombine.low %v120_v42, %v121_v43  ;;  %v208_v51 = vcombine.low %v138_v44, %v139_v45  ;;  %v91_v52 = vpop.permute.xlu0 %90  ;;  %v82_v53 = vpop.permute.xlu1 %81  ;;  %v423_v38 = vstv %s727_s17 }
  0xa2   :  { %v313_v56 = vcombine.low %v277_v46, %v278_v47  ;;  %v365_v57 = vcombine.low %v295_v48, %v296_v49  ;;  %v87_v58 = vsel %vm85_vm0, %v78_v32, %v82_v53  ;;  %v89_v59 = vsel %vm85_vm0, %v82_v53, %v78_v32 }
  0xa3   :  { %v163_v60 = vrot.slane %v156_v50, %v663_v5  ;;  %v215_v61 = vrot.slane %v208_v51, %v663_v5  ;;  %v122_v62 = vmul.f32 %v119_v20, %v87_v58  ;;  %v123_v63 = vmul.f32 %v119_v20, %v89_v59 }
  0xa4   :  { %v320_v0 = vrot.slane %v313_v56, %v663_v5  ;;  %v372_v1 = vrot.slane %v365_v57, %v663_v5  ;;  %v140_v2 = vmul.f32 %v137_v22, %v87_v58  ;;  %v141_v4 = vmul.f32 %v137_v22, %v89_v59 }
  0xa5   :  { %v742_v6 = vadd.f32 %v163_v60, %v117_v18  ;;  %v744_v7 = vadd.f32 %v215_v61, %v135_v21  ;;  %v164_v8 = vcombine.low %v122_v62, %v123_v63  ;;  %v279_v9 = vmul.f32 %v276_v25, %v87_v58  ;;  %v95_v10 = vpop.permute.xlu0 %94  ;;  %v97_v11 = vpop.permute.xlu1 %96 }
  0xa6   :  { %v746_v13 = vadd.f32 %v320_v0, %v274_v24  ;;  %v748_v14 = vadd.f32 %v372_v1, %v292_v28  ;;  %v216_v15 = vcombine.low %v140_v2, %v141_v4  ;;  %v280_v17 = vmul.f32 %v276_v25, %v89_v59 }
  0xa7   :  { %v171_v19 = vrot.slane %v164_v8, %v663_v5  ;;  %v297_v20 = vmul.f32 %v294_v29, %v87_v58  ;;  %v298_v22 = vmul.f32 %v294_v29, %v89_v59  ;;  %v99_v18 = vsel %vm98_vm1, %v91_v52, %v95_v10 }
  0xa8   :  { %v223_v21 = vrot.slane %v216_v15, %v663_v5  ;;  %v321_v32 = vcombine.low %v279_v9, %v280_v17  ;;  %v101_v33 = vsel %vm98_vm1, %v95_v10, %v91_v52  ;;  %v125_v25 = vmul.f32 %v703_v31, %v99_v18 }
  0xa9   :  { %v758_v24 = vadd.f32 %v171_v19, %v694_v23  ;;  %v373_v28 = vcombine.low %v297_v20, %v298_v22  ;;  %v126_v39 = vmul.f32 %v703_v31, %v101_v33  ;;  %v104_v42 = vpop.permute.xlu0 %103  ;;  %v106_v29 = vpop.permute.xlu1 %105  ;;  %v143_v45 = vmul.f32 %v706_v34, %v99_v18 }
  0xaa   :  { %v763_v43 = vadd.f32 %v223_v21, %v696_v26  ;;  %v328_v44 = vrot.slane %v321_v32, %v663_v5  ;;  %v144_v46 = vmul.f32 %v706_v34, %v101_v33  ;;  %v282_v23 = vmul.f32 %v709_v35, %v99_v18 }
  0xab   :  { %v380_v47 = vrot.slane %v373_v28, %v663_v5  ;;  %v283_v48 = vmul.f32 %v709_v35, %v101_v33  ;;  %v300_v49 = vmul.f32 %v712_v36, %v99_v18  ;;  %v301_v26 = vmul.f32 %v712_v36, %v101_v33 }
  0xac   :  { %v773_v50 = vadd.f32 %v328_v44, %v698_v27  ;;  %v100_v51 = vsel %vm98_vm1, %v688_v16, %v97_v11  ;;  %v102_v52 = vsel %vm98_vm1, %v97_v11, %v688_v16 }
  0xad   :  { %v783_v53 = vadd.f32 %v380_v47, %v700_v30  ;;  %v127_v56 = vmul.f32 %v703_v31, %v100_v51  ;;  %v128_v57 = vmul.f32 %v703_v31, %v102_v52  ;;  %v145_v27 = vmul.f32 %v706_v34, %v100_v51  ;;  %v108_v58 = vpop.permute.xlu0 %107  ;;  %v110_v59 = vpop.permute.xlu1 %109 }
  0xae   :  { %v146_v60 = vmul.f32 %v706_v34, %v102_v52  ;;  %v284_v61 = vmul.f32 %v709_v35, %v100_v51  ;;  %v285_v62 = vmul.f32 %v709_v35, %v102_v52  ;;  %v302_v63 = vmul.f32 %v712_v36, %v100_v51 }
  0xaf   :  { %v303_v16 = vmul.f32 %v712_v36, %v102_v52  ;;  %v112_v30 = vsel %vm111_vm2, %v104_v42, %v108_v58  ;;  %v114_v31 = vsel %vm111_vm2, %v108_v58, %v104_v42  ;;  %v113_v0 = vsel %vm111_vm2, %v106_v29, %v110_v59 }
  0xb0   :  { %v130_v1 = vmul.f32 %v715_v37, %v112_v30  ;;  %v131_v34 = vmul.f32 %v715_v37, %v114_v31  ;;  %v148_v2 = vmul.f32 %v722_v40, %v112_v30  ;;  %v149_v35 = vmul.f32 %v722_v40, %v114_v31 }
  0xb1   :  { %v287_v4 = vmul.f32 %v725_v41, %v112_v30  ;;  %v288_v36 = vmul.f32 %v725_v41, %v114_v31  ;;  %v305_v8 = vmul.f32 %v730_v54, %v112_v30  ;;  %v306_v9 = vmul.f32 %v730_v54, %v114_v31 }
  0xb2   :  { %v176_v10 = vadd.f32 %v130_v1, %v125_v25  ;;  %v177_v11 = vadd.f32 %v131_v34, %v126_v39  ;;  %v228_v15 = vadd.f32 %v148_v2, %v143_v45  ;;  %v229_v17 = vadd.f32 %v149_v35, %v144_v46 }
  0xb3   :  { %v333_v19 = vadd.f32 %v287_v4, %v282_v23  ;;  %v334_v20 = vadd.f32 %v288_v36, %v283_v48  ;;  %v385_v22 = vadd.f32 %v305_v8, %v300_v49  ;;  %v386_v18 = vadd.f32 %v306_v9, %v301_v26 }
  0xb4   :  { %v184_v21 = vcombine.low %v176_v10, %v177_v11  ;;  %v236_v32 = vcombine.low %v228_v15, %v229_v17  ;;  %v115_v33 = vsel %vm111_vm2, %v110_v59, %v106_v29  ;;  %v132_v28 = vmul.f32 %v715_v37, %v113_v0 }
  0xb5   :  { %v341_v42 = vcombine.low %v333_v19, %v334_v20  ;;  %v393_v44 = vcombine.low %v385_v22, %v386_v18  ;;  %v133_v47 = vmul.f32 %v715_v37, %v115_v33  ;;  %v150_v25 = vmul.f32 %v722_v40, %v113_v0 }
  0xb6   :  { %v191_v39 = vrot.slane %v184_v21, %v663_v5  ;;  %v243_v45 = vrot.slane %v236_v32, %v663_v5  ;;  %v151_v46 = vmul.f32 %v722_v40, %v115_v33  ;;  %v178_v23 = vadd.f32 %v132_v28, %v127_v56 }
  0xb7   :  { %v348_v48 = vrot.slane %v341_v42, %v663_v5  ;;  %v400_v12 = vrot.slane %v393_v44, %v663_v5  ;;  %v179_v29 = vadd.f32 %v133_v47, %v128_v57  ;;  %v230_v49 = vadd.f32 %v150_v25, %v145_v27 }
  0xb8   :  { %v202_v26 = vadd.f32 %v191_v39, %v742_v6  ;;  %v254_v51 = vadd.f32 %v243_v45, %v744_v7  ;;  %v231_v37 = vadd.f32 %v151_v46, %v146_v60  ;;  %v289_v52 = vmul.f32 %v725_v41, %v113_v0 }
  0xb9   :  { %v359_v58 = vadd.f32 %v348_v48, %v746_v13  ;;  %v411_v59 = vadd.f32 %v400_v12, %v748_v14  ;;  %v192_v30 = vcombine.low %v178_v23, %v179_v29  ;;  %v290_v40 = vmul.f32 %v725_v41, %v115_v33 }
  0xba   :  { %v536_v56 = vrot.slane %v254_v51, 9  ;;  %v244_v31 = vcombine.low %v230_v49, %v231_v37  ;;  %v307_v57 = vmul.f32 %v730_v54, %v113_v0  ;;  %v308_v27 = vmul.f32 %v730_v54, %v115_v33 }
  0xbb   :  { %v538_v6 = vrot.slane %v411_v59, 9  ;;  %v199_v7 = vrot.slane %v192_v30, %v663_v5  ;;  %v335_v60 = vadd.f32 %v289_v52, %v284_v61  ;;  %v336_v1 = vadd.f32 %v290_v40, %v285_v62 }
  0xbc   :  { %v264_v34 = vadd.f32 %v536_v56, %v202_v26  ;;  %v251_v13 = vrot.slane %v244_v31, %v663_v5  ;;  %v387_v14 = vadd.f32 %v307_v57, %v302_v63  ;;  %v388_v2 = vadd.f32 %v308_v27, %v303_v16 }
  0xbd   :  { %v421_v35 = vadd.f32 %v538_v6, %v359_v58  ;;  %v203_v41 = vadd.f32 %v199_v7, %v758_v24  ;;  %v349_v4 = vcombine.low %v335_v60, %v336_v1  ;;  %v434_v62 = vsub.s32 0, %v660_v3 }
  0xbe   :  { %v255_v36 = vadd.f32 %v251_v13, %v763_v43  ;;  %v401_v0 = vcombine.low %v387_v14, %v388_v2  ;;  %v267_v54 = vadd.f32 %v266_v55, %v264_v34  ;;  %v438_v10 = vsub.s32 2, %v660_v3 }
  0xbf   :  { %v356_v8 = vrot.slane %v349_v4, %v663_v5  ;;  %v424_v61 = vadd.f32 %v423_v38, %v421_v35 }
  0xc0   :  { %v537_v9 = vrot.slane %v255_v36, 9  ;;  %v408_v63 = vrot.slane %v401_v0, %v663_v5  ;;  %v269_v16 = vmul.f32 0.7195699, %v267_v54 }
  0xc1   :  { %v360_v24 = vadd.f32 %v356_v8, %v773_v50  ;;  %v426_v11 = vmul.f32 0.7195699, %v424_v61 }
  0xc2   :  { %v265_v43 = vadd.f32 %v537_v9, %v203_v41  ;;  %v412_v15 = vadd.f32 %v408_v63, %v783_v53  ;;  %v271_v17 = vmax.f32 %v267_v54, %v269_v16 }
  0xc3   :  { %v428_v19 = vmax.f32 %v424_v61, %v426_v11 }
  0xc4   :  { %v539_v20 = vrot.slane %v412_v15, 9  ;;  %v268_v22 = vadd.f32 %v266_v55, %v265_v43  ;;  %v435_v18 = vrot.slane %v271_v17, %v434_v62  ;;  %v439_v21 = vrot.slane %v271_v17, %v438_v10 }
  0xc5   :  { %v457_v32 = vrot.slane %v428_v19, %v434_v62  ;;  %v461_v5 = vrot.slane %v428_v19, %v438_v10 }
  0xc6   :  { %v422_v33 = vadd.f32 %v539_v20, %v360_v24  ;;  %v270_v28 = vmul.f32 0.7195699, %v268_v22 }
  0xc7   :  { %v475_v3 = vsel %vm474_vm3, %v435_v18, %v457_v32  ;;  %v476_v50 = vsel %vm474_vm3, %v439_v21, %v461_v5 }
  0xc8   :  { %v272_v42 = vmax.f32 %v268_v22, %v270_v28  ;;  %v425_v44 = vadd.f32 %v423_v38, %v422_v33  ;;  %v483_v53 = vcombine.low %v475_v3, %v476_v50 }
  0xca   :  { %v427_v47 = vmul.f32 0.7195699, %v425_v44  ;;  %v443_v25 = vrot.slane %v272_v42, %v434_v62  ;;  %v447_v39 = vrot.slane %v272_v42, %v438_v10  ;;  %540 = vst.sshfl [vmem:[#allocation8] sm:$0x33 pattern:$0x76325410] %v483_v53 }
  0xcc   :  { %v429_v45 = vmax.f32 %v425_v44, %v427_v47 }
  0xce   :  { %v465_v55 = vrot.slane %v429_v45, %v434_v62  ;;  %v469_v46 = vrot.slane %v429_v45, %v438_v10 }
  0xd0   :  { %v477_v23 = vsel %vm474_vm3, %v443_v25, %v465_v55  ;;  %v478_v48 = vsel %vm474_vm3, %v447_v39, %v469_v46 }
  0xd1   :  { %v491_v12 = vcombine.low %v477_v23, %v478_v48 }
  0xd3   :  { %541 = vst.sshfl [vmem:[#allocation8 + $0x4] sm:$0x33 pattern:$0x76325410] %v491_v12 }
  0xd4   :  { %603 = shalt.err (!%p600_p0)
}
  0xd5   :  { %514 = dma.vmem_to_hbm [thread:$0]  %s509_s19, 128, %s855_s3, [#allocation7], %s621_s1, %s621_s1, %s622_s22  }
  0xd6   :  { %616 = dma.done.wait [#allocation7], 128  }
  0xd7   :  { %617 = vsyncadd [#allocation7], 4294967168 }
  0xd8   :  { %518 = vsyncpa [#allocation6], 1 }
  0xd9   :  { %519 = vsyncpa [#allocation7], 1 }

</bundles_post_ra>
